<compile_context>
chip_gen: v7x
topology: tpu7x:2x2x1
jax: 0.10.0
libtpu: 0.0.40
codegen_flags: <defaults>
</compile_context>

<pallas_src>
import jax
import jax.numpy as jnp
from jax import lax
from jax.experimental import pallas as pl
from jax.experimental.pallas import tpu as pltpu

LANE = 128
SUBLANE = 8
OUT_W = 8          # packed output lanes: 0=pi, 1=logp_pi, 2=logp(action)
MAX_TILE_B = 512   # rows per batch tile; well inside default scoped VMEM


def _round_up(n, m):
    return ((n + m - 1) // m) * m


def _choose_tile_b(batch):
    # Tiny batches: one full-extent block (legal for any batch size).
    # Otherwise: at least two grid steps whenever possible (keeps both v7x
    # TensorCores busy), capped at MAX_TILE_B rows.
    if batch <= 2 * SUBLANE:
        return batch
    return min(MAX_TILE_B, _round_up(-(-batch // 2), SUBLANE))


def _make_policy_kernel(num_actions, act_lanes):
    # NOTE: only Python ints are closed over; every numeric constant inside
    # the kernel is a Python literal (no captured traced constants).

    def kernel(x_ref, w1_ref, b1_ref, w2_ref, b2_ref, aux_ref, out_ref):
        # ---- policy MLP: bf16 operands on the MXU, f32 accumulation ----
        x = x_ref[...].astype(jnp.bfloat16)
        h = jnp.tanh(
            jnp.dot(x, w1_ref[...], preferred_element_type=jnp.float32)
            + b1_ref[...]
        )
        logits = (
            jnp.dot(h.astype(jnp.bfloat16), w2_ref[...],
                    preferred_element_type=jnp.float32)
            + b2_ref[...]
        )

        # Mask padded action lanes so reductions / sampling ignore them.
        col = lax.broadcasted_iota(jnp.int32, logits.shape, 1)
        logits = jnp.where(col < num_actions, logits, -1e30)

        # ---- shared softmax pieces: single exp + single log per row ----
        m = jnp.max(logits, axis=-1, keepdims=True)
        z = logits - m
        p = jnp.exp(z)                                   # padded lanes -> 0
        total = jnp.sum(p, axis=-1, keepdims=True)
        lse = jnp.log(total)

        # ---- categorical sampling by inverse CDF (reuses p, no Gumbel logs) ----
        u = aux_ref[:, 0:1]                              # uniform in [0, 1)
        act = aux_ref[:, 1:2].astype(jnp.int32)          # action_taken (or 0)
        # Lane prefix-sum via a lower-triangular-ones matmul: MXU is nearly
        # idle here, and this avoids extra EUP work and roll chains.
        r_i = lax.broadcasted_iota(jnp.int32, (act_lanes, act_lanes), 0)
        c_i = lax.broadcasted_iota(jnp.int32, (act_lanes, act_lanes), 1)
        tri = (r_i <= c_i).astype(jnp.float32)
        cdf = jnp.dot(p, tri, preferred_element_type=jnp.float32)
        thr = u * total
        pi = jnp.sum((cdf <= thr).astype(jnp.int32), axis=-1, keepdims=True)
        pi = jnp.minimum(pi, num_actions - 1)

        # ---- log-prob "gathers" without materializing logp_all ----
        z_pi = jnp.sum(jnp.where(col == pi, z, 0.0), axis=-1, keepdims=True)
        z_act = jnp.sum(jnp.where(col == act, z, 0.0), axis=-1, keepdims=True)
        logp_pi = z_pi - lse
        logp_act = z_act - lse

        # ---- packed (tile_b, 8) output slab ----
        col8 = lax.broadcasted_iota(jnp.int32, out_ref.shape, 1)
        slab = jnp.where(col8 == 0, pi.astype(jnp.float32), 0.0)
        slab = jnp.where(col8 == 1, logp_pi, slab)
        slab = jnp.where(col8 == 2, logp_act, slab)
        out_ref[...] = slab

    return kernel


def init_params(key, obs_dim, hidden_dim, action_dim):
    """hidden/action dims lane-padded once at init; padded rows/cols are zero
    so results equal the unpadded MLP exactly.  Weights stored bf16 (MXU
    operands); biases stay f32 and start at zero (matches nn.init.zeros_)."""
    hid_p = _round_up(hidden_dim, LANE)
    act_p = _round_up(action_dim, LANE)
    k1, k2 = jax.random.split(key)
    scale = 0.1
    w1 = jnp.zeros((obs_dim, hid_p), jnp.float32).at[:, :hidden_dim].set(
        scale * jax.random.normal(k1, (obs_dim, hidden_dim), jnp.float32)
    )
    w2 = jnp.zeros((hid_p, act_p), jnp.float32).at[:hidden_dim, :action_dim].set(
        scale * jax.random.normal(k2, (hidden_dim, action_dim), jnp.float32)
    )
    return {
        "w1": w1.astype(jnp.bfloat16),
        "b1": jnp.zeros((1, hid_p), jnp.float32),
        "w2": w2.astype(jnp.bfloat16),
        "b2": jnp.zeros((1, act_p), jnp.float32),
        "obs_dim": obs_dim, "hidden_dim": hidden_dim, "action_dim": action_dim,
    }


def categorical_policy_forward(x, params, key, action_taken=None):
    """Returns (pi, logp, logp_pi) matching CategoricalPolicyNet.forward."""
    B, obs_dim = x.shape
    A = params["action_dim"]
    hid_p = params["w1"].shape[1]
    act_p = params["w2"].shape[1]

    # One uniform per row drives the in-kernel inverse-CDF categorical sample.
    u = jax.random.uniform(key, (B, 1), jnp.float32)
    if action_taken is None:
        act_col = jnp.zeros((B, 1), jnp.float32)
    else:
        act_col = action_taken.astype(jnp.float32)[:, None]
    aux = jnp.concatenate([u, act_col], axis=1)          # (B, 2) — tiny

    tile_b = _choose_tile_b(B)
    grid = (pl.cdiv(B, tile_b),)

    kernel = _make_policy_kernel(A, act_p)

    cost = pl.CostEstimate(
        flops=2 * B * (obs_dim * hid_p + hid_p * act_p + act_p * act_p),
        transcendentals=B * (hid_p + act_p + 1),
        bytes_accessed=int(x.size) * 4 + int(aux.size) * 4 + B * OUT_W * 4
        + int(params["w1"].size) * 2 + int(params["w2"].size) * 2
        + (hid_p + act_p) * 4,
    )

    out = pl.pallas_call(
        kernel,
        out_shape=jax.ShapeDtypeStruct((B, OUT_W), jnp.float32),
        grid=grid,
        in_specs=[
            pl.BlockSpec((tile_b, obs_dim), lambda i: (i, 0)),   # x tile (no pad copy)
            pl.BlockSpec((obs_dim, hid_p), lambda i: (0, 0)),    # w1 (VMEM resident)
            pl.BlockSpec((1, hid_p), lambda i: (0, 0)),          # b1
            pl.BlockSpec((hid_p, act_p), lambda i: (0, 0)),      # w2 (VMEM resident)
            pl.BlockSpec((1, act_p), lambda i: (0, 0)),          # b2
            pl.BlockSpec((tile_b, 2), lambda i: (i, 0)),         # [uniform, action]
        ],
        out_specs=pl.BlockSpec((tile_b, OUT_W), lambda i: (i, 0)),
        compiler_params=pltpu.CompilerParams(
            dimension_semantics=("parallel",),   # megacore / v7x dual-TC split
        ),
        cost_estimate=cost,
    )(x.astype(jnp.float32), params["w1"], params["b1"], params["w2"],
      params["b2"], aux)

    pi = out[:, 0].astype(jnp.int32)
    logp_pi = out[:, 1]
    logp = out[:, 2] if action_taken is not None else None
    return pi, logp, logp_pi


if __name__ == "__main__":
    B, OBS, HIDDEN, NUM_ACTIONS = 8, 16, 64, 6

    root = jax.random.PRNGKey(0)
    k_param, k_x, k_act, k_sample = jax.random.split(root, 4)

    params = init_params(k_param, OBS, HIDDEN, NUM_ACTIONS)
    x = jax.random.normal(k_x, (B, OBS), jnp.float32)
    action_taken = jax.random.randint(k_act, (B,), 0, NUM_ACTIONS)

    pi, logp, logp_pi = categorical_policy_forward(
        x, params, key=k_sample, action_taken=action_taken
    )
    jax.block_until_ready((pi, logp, logp_pi))

    assert pi.shape == (B,) and logp.shape == (B,) and logp_pi.shape == (B,)
    assert bool(jnp.all((pi >= 0) & (pi < NUM_ACTIONS)))

    # Deterministic parts checked against a plain-JAX reference that mirrors
    # the kernel's bf16-matmul / f32-accumulate dtype path.
    w1 = params["w1"][:, :HIDDEN]                   # (OBS, HIDDEN) bf16
    w2 = params["w2"][:HIDDEN, :NUM_ACTIONS]        # (HIDDEN, A)  bf16
    h_ref = jnp.tanh(jnp.dot(x.astype(jnp.bfloat16), w1,
                             preferred_element_type=jnp.float32))
    logits_ref = jnp.dot(h_ref.astype(jnp.bfloat16), w2,
                         preferred_element_type=jnp.float32)
    logp_all_ref = jax.nn.log_softmax(logits_ref, axis=-1)
    ref_logp = jnp.take_along_axis(logp_all_ref, action_taken[:, None], axis=-1)[:, 0]
    ref_logp_pi = jnp.take_along_axis(logp_all_ref, pi[:, None], axis=-1)[:, 0]
    assert bool(jnp.allclose(logp, ref_logp, atol=2e-3, rtol=2e-3))
    assert bool(jnp.allclose(logp_pi, ref_logp_pi, atol=2e-3, rtol=2e-3))

    print("KERNEL_OK")
</pallas_src>

<mosaic_0001>
module attributes {stable_mosaic.version = 11 : i64} {
  func.func @kernel(%arg0: i32, %arg1: memref<8x16xf32, #tpu.memory_space<vmem>>, %arg2: memref<16x128xbf16, #tpu.memory_space<vmem>>, %arg3: memref<1x128xf32, #tpu.memory_space<vmem>>, %arg4: memref<128x128xbf16, #tpu.memory_space<vmem>>, %arg5: memref<1x128xf32, #tpu.memory_space<vmem>>, %arg6: memref<8x2xf32, #tpu.memory_space<vmem>>, %arg7: memref<8x8xf32, #tpu.memory_space<vmem>>) attributes {dimension_semantics = [#tpu.dimension_semantics<parallel>], iteration_bounds = array<i64: 1>, scalar_prefetch = 0 : i64, scratch_operands = 0 : i64, tpu.core_type = #tpu.core_type<tc>, window_params = [{transform_indices = @transform_0, window_bounds = array<i64: 8, 16>}, {pipeline_mode = #tpu.pipeline_mode<synchronous>, transform_indices = @transform_1, window_bounds = array<i64: 16, 128>}, {pipeline_mode = #tpu.pipeline_mode<synchronous>, transform_indices = @transform_2, window_bounds = array<i64: 1, 128>}, {pipeline_mode = #tpu.pipeline_mode<synchronous>, transform_indices = @transform_3, window_bounds = array<i64: 128, 128>}, {pipeline_mode = #tpu.pipeline_mode<synchronous>, transform_indices = @transform_4, window_bounds = array<i64: 1, 128>}, {transform_indices = @transform_5, window_bounds = array<i64: 8, 2>}, {transform_indices = @transform_6, window_bounds = array<i64: 8, 8>}]} {
    %c0 = arith.constant 0 : index
    %c0_0 = arith.constant 0 : index
    %0 = vector.load %arg1[%c0, %c0_0] : memref<8x16xf32, #tpu.memory_space<vmem>>, vector<8x16xf32>
    %1 = arith.truncf %0 : vector<8x16xf32> to vector<8x16xbf16>
    %c0_1 = arith.constant 0 : index
    %c0_2 = arith.constant 0 : index
    %2 = vector.load %arg2[%c0_1, %c0_2] : memref<16x128xbf16, #tpu.memory_space<vmem>>, vector<16x128xbf16>
    %cst = arith.constant dense<0.000000e+00> : vector<8x128xf32>
    %3 = tpu.matmul %1, %2, %cst {dimension_numbers = #tpu.dot_dimension_numbers<[1], [0], [0], [1], [0, 0, 1, 1], [], []>} : vector<8x16xbf16>, vector<16x128xbf16>, vector<8x128xf32> -> vector<8x128xf32>
    %c0_3 = arith.constant 0 : index
    %c0_4 = arith.constant 0 : index
    %4 = vector.load %arg3[%c0_3, %c0_4] : memref<1x128xf32, #tpu.memory_space<vmem>>, vector<1x128xf32>
    %5 = vector.broadcast %4 : vector<1x128xf32> to vector<8x128xf32>
    %6 = arith.addf %3, %5 : vector<8x128xf32>
    %7 = math.tanh %6 : vector<8x128xf32>
    %8 = arith.truncf %7 : vector<8x128xf32> to vector<8x128xbf16>
    %c0_5 = arith.constant 0 : index
    %c0_6 = arith.constant 0 : index
    %9 = vector.load %arg4[%c0_5, %c0_6] : memref<128x128xbf16, #tpu.memory_space<vmem>>, vector<128x128xbf16>
    %cst_7 = arith.constant dense<0.000000e+00> : vector<8x128xf32>
    %10 = tpu.matmul %8, %9, %cst_7 {dimension_numbers = #tpu.dot_dimension_numbers<[1], [0], [0], [1], [0, 0, 1, 1], [], []>} : vector<8x128xbf16>, vector<128x128xbf16>, vector<8x128xf32> -> vector<8x128xf32>
    %c0_8 = arith.constant 0 : index
    %c0_9 = arith.constant 0 : index
    %11 = vector.load %arg5[%c0_8, %c0_9] : memref<1x128xf32, #tpu.memory_space<vmem>>, vector<1x128xf32>
    %12 = vector.broadcast %11 : vector<1x128xf32> to vector<8x128xf32>
    %13 = arith.addf %10, %12 : vector<8x128xf32>
    %14 = tpu.iota {dimensions = array<i32: 1>} : vector<8x128xi32>
    %c6_i32 = arith.constant 6 : i32
    %15 = vector.broadcast %c6_i32 : i32 to vector<8x128xi32>
    %16 = arith.cmpi slt, %14, %15 : vector<8x128xi32>
    %cst_10 = arith.constant -1.000000e+30 : f32
    %17 = vector.broadcast %cst_10 : f32 to vector<8x128xf32>
    %18 = arith.select %16, %13, %17 : vector<8x128xi1>, vector<8x128xf32>
    %cst_11 = arith.constant dense<0xFF800000> : vector<8xf32>
    %19 = vector.multi_reduction <maximumf>, %18, %cst_11 [1] : vector<8x128xf32> to vector<8xf32>
    %20 = vector.shape_cast %19 : vector<8xf32> to vector<8x1xf32>
    %21 = vector.broadcast %20 : vector<8x1xf32> to vector<8x128xf32>
    %22 = arith.subf %18, %21 : vector<8x128xf32>
    %23 = math.exp %22 : vector<8x128xf32>
    %cst_12 = arith.constant dense<0.000000e+00> : vector<8xf32>
    %24 = vector.multi_reduction <add>, %23, %cst_12 [1] : vector<8x128xf32> to vector<8xf32>
    %25 = vector.shape_cast %24 : vector<8xf32> to vector<8x1xf32>
    %26 = math.log %25 : vector<8x1xf32>
    %c0_13 = arith.constant 0 : index
    %c0_14 = arith.constant 0 : index
    %27 = vector.load %arg6[%c0_13, %c0_14] : memref<8x2xf32, #tpu.memory_space<vmem>>, vector<8x1xf32>
    %c0_15 = arith.constant 0 : index
    %c1 = arith.constant 1 : index
    %28 = vector.load %arg6[%c0_15, %c1] : memref<8x2xf32, #tpu.memory_space<vmem>>, vector<8x1xf32>
    %29 = arith.fptosi %28 : vector<8x1xf32> to vector<8x1xi32>
    %30 = tpu.iota {dimensions = array<i32: 0>} : vector<128x128xi32>
    %31 = tpu.iota {dimensions = array<i32: 1>} : vector<128x128xi32>
    %32 = arith.cmpi sle, %30, %31 : vector<128x128xi32>
    %33 = arith.extui %32 : vector<128x128xi1> to vector<128x128xi32>
    %34 = arith.sitofp %33 : vector<128x128xi32> to vector<128x128xf32>
    %cst_16 = arith.constant dense<0.000000e+00> : vector<8x128xf32>
    %35 = tpu.matmul %23, %34, %cst_16 {dimension_numbers = #tpu.dot_dimension_numbers<[1], [0], [0], [1], [0, 0, 1, 1], [], []>} : vector<8x128xf32>, vector<128x128xf32>, vector<8x128xf32> -> vector<8x128xf32>
    %36 = arith.mulf %27, %25 : vector<8x1xf32>
    %37 = vector.broadcast %36 : vector<8x1xf32> to vector<8x128xf32>
    %38 = arith.cmpf ole, %35, %37 : vector<8x128xf32>
    %39 = arith.extui %38 : vector<8x128xi1> to vector<8x128xi32>
    %cst_17 = arith.constant dense<0> : vector<8xi32>
    %40 = vector.multi_reduction <add>, %39, %cst_17 [1] : vector<8x128xi32> to vector<8xi32>
    %41 = vector.shape_cast %40 : vector<8xi32> to vector<8x1xi32>
    %c5_i32 = arith.constant 5 : i32
    %42 = vector.broadcast %c5_i32 : i32 to vector<8x1xi32>
    %43 = arith.minsi %41, %42 : vector<8x1xi32>
    %44 = vector.broadcast %43 : vector<8x1xi32> to vector<8x128xi32>
    %45 = arith.cmpi eq, %14, %44 : vector<8x128xi32>
    %cst_18 = arith.constant 0.000000e+00 : f32
    %46 = vector.broadcast %cst_18 : f32 to vector<8x128xf32>
    %47 = arith.select %45, %22, %46 : vector<8x128xi1>, vector<8x128xf32>
    %cst_19 = arith.constant dense<0.000000e+00> : vector<8xf32>
    %48 = vector.multi_reduction <add>, %47, %cst_19 [1] : vector<8x128xf32> to vector<8xf32>
    %49 = vector.shape_cast %48 : vector<8xf32> to vector<8x1xf32>
    %50 = vector.broadcast %29 : vector<8x1xi32> to vector<8x128xi32>
    %51 = arith.cmpi eq, %14, %50 : vector<8x128xi32>
    %cst_20 = arith.constant 0.000000e+00 : f32
    %52 = vector.broadcast %cst_20 : f32 to vector<8x128xf32>
    %53 = arith.select %51, %22, %52 : vector<8x128xi1>, vector<8x128xf32>
    %cst_21 = arith.constant dense<0.000000e+00> : vector<8xf32>
    %54 = vector.multi_reduction <add>, %53, %cst_21 [1] : vector<8x128xf32> to vector<8xf32>
    %55 = vector.shape_cast %54 : vector<8xf32> to vector<8x1xf32>
    %56 = arith.subf %49, %26 : vector<8x1xf32>
    %57 = arith.subf %55, %26 : vector<8x1xf32>
    %58 = tpu.iota {dimensions = array<i32: 1>} : vector<8x8xi32>
    %c0_i32 = arith.constant 0 : i32
    %59 = vector.broadcast %c0_i32 : i32 to vector<8x8xi32>
    %60 = arith.cmpi eq, %58, %59 : vector<8x8xi32>
    %61 = arith.sitofp %43 : vector<8x1xi32> to vector<8x1xf32>
    %cst_22 = arith.constant 0.000000e+00 : f32
    %62 = vector.shape_cast %61 : vector<8x1xf32> to vector<8x1xf32>
    %63 = vector.broadcast %62 : vector<8x1xf32> to vector<8x8xf32>
    %64 = vector.broadcast %cst_22 : f32 to vector<8x8xf32>
    %65 = arith.select %60, %63, %64 : vector<8x8xi1>, vector<8x8xf32>
    %c1_i32 = arith.constant 1 : i32
    %66 = vector.broadcast %c1_i32 : i32 to vector<8x8xi32>
    %67 = arith.cmpi eq, %58, %66 : vector<8x8xi32>
    %68 = vector.shape_cast %56 : vector<8x1xf32> to vector<8x1xf32>
    %69 = vector.broadcast %68 : vector<8x1xf32> to vector<8x8xf32>
    %70 = arith.select %67, %69, %65 : vector<8x8xi1>, vector<8x8xf32>
    %c2_i32 = arith.constant 2 : i32
    %71 = vector.broadcast %c2_i32 : i32 to vector<8x8xi32>
    %72 = arith.cmpi eq, %58, %71 : vector<8x8xi32>
    %73 = vector.shape_cast %57 : vector<8x1xf32> to vector<8x1xf32>
    %74 = vector.broadcast %73 : vector<8x1xf32> to vector<8x8xf32>
    %75 = arith.select %72, %74, %70 : vector<8x8xi1>, vector<8x8xf32>
    %c0_23 = arith.constant 0 : index
    %c0_24 = arith.constant 0 : index
    %76 = vector.load %arg7[%c0_23, %c0_24] : memref<8x8xf32, #tpu.memory_space<vmem>>, vector<8x8xf32>
    tpu.vector_store %arg7[%c0_23, %c0_24], %75 {strides = array<i32>} : memref<8x8xf32, #tpu.memory_space<vmem>>, vector<8x8xf32>,
    return
  }
  func.func @transform_0(%arg0: i32) -> (i32, i32) {
    %c0_i32 = arith.constant 0 : i32
    %c0_i32_0 = arith.constant 0 : i32
    return %arg0, %c0_i32 : i32, i32
  }
  func.func @transform_1(%arg0: i32) -> (i32, i32) {
    %c0_i32 = arith.constant 0 : i32
    %c0_i32_0 = arith.constant 0 : i32
    %c0_i32_1 = arith.constant 0 : i32
    return %c0_i32, %c0_i32_0 : i32, i32
  }
  func.func @transform_2(%arg0: i32) -> (i32, i32) {
    %c0_i32 = arith.constant 0 : i32
    %c0_i32_0 = arith.constant 0 : i32
    %c0_i32_1 = arith.constant 0 : i32
    return %c0_i32, %c0_i32_0 : i32, i32
  }
  func.func @transform_3(%arg0: i32) -> (i32, i32) {
    %c0_i32 = arith.constant 0 : i32
    %c0_i32_0 = arith.constant 0 : i32
    %c0_i32_1 = arith.constant 0 : i32
    return %c0_i32, %c0_i32_0 : i32, i32
  }
  func.func @transform_4(%arg0: i32) -> (i32, i32) {
    %c0_i32 = arith.constant 0 : i32
    %c0_i32_0 = arith.constant 0 : i32
    %c0_i32_1 = arith.constant 0 : i32
    return %c0_i32, %c0_i32_0 : i32, i32
  }
  func.func @transform_5(%arg0: i32) -> (i32, i32) {
    %c0_i32 = arith.constant 0 : i32
    %c0_i32_0 = arith.constant 0 : i32
    return %arg0, %c0_i32 : i32, i32
  }
  func.func @transform_6(%arg0: i32) -> (i32, i32) {
    %c0_i32 = arith.constant 0 : i32
    %c0_i32_0 = arith.constant 0 : i32
    return %arg0, %c0_i32 : i32, i32
  }
}

</mosaic_0001>

<bundles_post_ra>
// kernel: tpu_custom_call.1
= control target key start
LH: loop header
LB: loop body
LE: loop exit
PB: predicated region body
PF: predicated region fallthrough
CT: control target
= control target key end

     0   :  { %11 = vsyncpa [#allocation3], 0  ;;  %s822_s0 = inlined_call_operand.vmem [shape: f32[8,16], index: 0, kind: input, shape index: {}]   ;;  %s823_s1 = inlined_call_operand.hbm [shape: bf16[16,128], index: 1, kind: input, shape index: {}]   ;;  %s824_s2 = inlined_call_operand.vmem [shape: f32[1,128], index: 2, kind: input, shape index: {}]   ;;  %s825_s3 = inlined_call_operand.hbm [shape: bf16[128,128], index: 3, kind: input, shape index: {}]   ;;  %s826_s4 = inlined_call_operand.vmem [shape: f32[1,128], index: 4, kind: input, shape index: {}]   ;;  %s827_s5 = inlined_call_operand.vmem [shape: f32[8,2], index: 5, kind: input, shape index: {}]   ;;  %s828_s6 = inlined_call_operand.hbm [shape: f32[8,8], index: 6, kind: output, shape index: {}]  }
   0x1   :  { %12 = vsyncpa [#allocation6], 0 }
   0x2   :  { %13 = vsyncpa [#allocation4], 0  ;;  %s696_s21 = smov [#allocation2]   ;;  %s624_s25 = scalar_lea.hbm %s823_s1, 128 }
   0x3   :  { %s21_s22 = sshll.u32 %s696_s21, 4  ;;  %p625_p0 = scmp.ne.s32.totalorder %s823_s1, %s624_s25  ;;  %s22_s22 = int_to_ptr.vmem [resolvable:$true] %s21_s22 }
   0x4   :  { %p628_p1 = scmp.lt.u32.totalorder %s624_s25, %s823_s1 }
   0x6   :  { %p630_p2 = pnand %p628_p1, %p625_p0 }
   0x8   :  { %633 = shalt.err (!%p630_p2)
}
   0x9   :  { %s634_s30 = scalar_lea.vmem %s22_s22, 128  ;;  %p639_p4 = scmp.lt.s32.totalorder %s22_s22, %s22_s22 }
   0xa   :  { %p635_p3 = scmp.ne.s32.totalorder %s22_s22, %s634_s30  ;;  %p640_p5 = scmp.lt.s32.totalorder %s634_s30, %s634_s30 }
   0xc   :  { %p641_p6 = por %p640_p5, %p639_p4 }
   0xe   :  { %p642_p7 = pnand %p641_p6, %p635_p3 }
  0x10   :  { %645 = shalt.err (!%p642_p7)
}
  0x11   :  { %s697_s7 = smov 64   ;;  %s698_s8 = smov 4  }
  0x12   :  { %27 = dma.hbm_to_vmem [thread:$0]  %s823_s1, 128, %s22_s22, [#allocation3], %s697_s7, %s697_s7, %s698_s8  }
  0x13   :  { %s699_s11 = smov [#allocation5]   ;;  %s646_s15 = scalar_lea.hbm %s825_s3, 1024 }
  0x14   :  { %s35_s12 = sshll.u32 %s699_s11, 4  ;;  %p647_p8 = scmp.ne.s32.totalorder %s825_s3, %s646_s15  ;;  %s36_s12 = int_to_ptr.vmem [resolvable:$true] %s35_s12 }
  0x15   :  { %p650_p9 = scmp.lt.u32.totalorder %s646_s15, %s825_s3 }
  0x17   :  { %p652_p10 = pnand %p650_p9, %p647_p8 }
  0x19   :  { %655 = shalt.err (!%p652_p10)
}
  0x1a   :  { %s656_s20 = scalar_lea.vmem %s36_s12, 1024  ;;  %p661_p12 = scmp.lt.s32.totalorder %s36_s12, %s36_s12 }
  0x1b   :  { %p657_p11 = scmp.ne.s32.totalorder %s36_s12, %s656_s20  ;;  %p662_p13 = scmp.lt.s32.totalorder %s656_s20, %s656_s20 }
  0x1d   :  { %p663_p0 = por %p662_p13, %p661_p12 }
  0x1f   :  { %p664_p1 = pnand %p663_p0, %p657_p11 }
  0x21   :  { %667 = shalt.err (!%p664_p1)
}
  0x22   :  { %41 = dma.hbm_to_vmem [thread:$0]  %s825_s3, 1024, %s36_s12, [#allocation6], %s697_s7, %s697_s7, %s698_s8  }
  0x23   :  { %690 = dma.done.wait [#allocation3], 128  }
  0x24   :  { %691 = vsyncadd [#allocation3], 4294967168 }
  0x25   :  { %692 = dma.done.wait [#allocation6], 1024  }
  0x26   :  { %693 = vsyncadd [#allocation6], 4294966272  ;;  %v700_v0 = vmov 0.0   ;;  %vm701_vm0 = vmmov 0   ;;  %v609_v1 = vld [vmem:[#allocation2] sm:$0xff]   ;;  %vm70_vm1 = vcmask 130048   ;;  %v227_v20 = vlaneseq }
  0x27   :  { %509 = vmatprep.subr.bf16.mxu0 %v700_v0  ;;  %511 = vmatprep.mubr.msk.bf16.mxu0 %vm701_vm0, %v700_v0  ;;  %v53_v2 = vld [vmem:[%s822_s0] sm:$0xff]  ;;  %v610_v4 = vld [vmem:[#allocation5] sm:$0xff]   ;;  %v611_v5 = vld [vmem:[#allocation5 + $0x8] sm:$0xff]   ;;  %v702_v23 = vmov 0.0|0.0   ;;  %v703_v29 = vmov 1.0|1.0  }
  0x28   :  { %515 = vmatprep.subr.bf16.mxu1 %v700_v0  ;;  %531 = vmatprep.mubr.msk.bf16.mxu1 %vm701_vm0, %v700_v0  ;;  %v54_v3 = vpack.c.bf16 %v53_v2, %v53_v2  ;;  %v612_v6 = vld [vmem:[#allocation5 + $0x10] sm:$0xff]   ;;  %v613_v7 = vld [vmem:[#allocation5 + $0x18] sm:$0xff]   ;;  %v614_v8 = vld [vmem:[#allocation5 + $0x20] sm:$0xff]   ;;  %v772_v21 = vand.u32 127, %v227_v20  ;;  %v243_v22 = vshrl.u32 %v227_v20, 7  ;;  %v704_v51 = vmov 0  }
  0x29   :  { %510 = vmatpush3.bf16.msra.mxu0 %v609_v1  ;;  %516 = vmatpush3.bf16.msra.mxu1 %v610_v4  ;;  %v615_v9 = vld [vmem:[#allocation5 + $0x28] sm:$0xff]   ;;  %v616_v10 = vld [vmem:[#allocation5 + $0x30] sm:$0xff]   ;;  %v617_v11 = vld [vmem:[#allocation5 + $0x38] sm:$0xff]   ;;  %v705_v55 = vmov 1  }
  0x2a   :  { %517 = vmatprep.subr.bf16.mxu1 %v700_v0  ;;  %v437_v12 = vld [vmem:[%s824_s2] ss:$0 sm:$0xff]  ;;  %570 = vmatprep.subr.bf16.mxu0 %v702_v23  ;;  %v244_v24 = vadd.s32 8, %v243_v22  ;;  %vm259_vm2 = vcmp.le.s32.totalorder %v243_v22, %v772_v21  ;;  %v245_v25 = vadd.s32 16, %v243_v22  ;;  %v246_v26 = vadd.s32 24, %v243_v22 }
  0x2b   :  { %v247_v27 = vadd.s32 32, %v243_v22  ;;  %v248_v28 = vadd.s32 40, %v243_v22  ;;  %v249_v30 = vadd.s32 48, %v243_v22  ;;  %v250_v31 = vadd.s32 56, %v243_v22  ;;  %v440_v32 = vld [vmem:[%s826_s4] ss:$0 sm:$0xff]  ;;  %607 = vset.pattern.permute.xlu1 %v704_v51  ;;  %608 = vset.pattern.permute.xlu0 %v705_v55 }
  0x2c   :  { %512 = vmatmul.mubr.msk.bf16.vlgmr.msra.gmra.mrb[0].mxu0 %vm70_vm1, %v54_v3  ;;  %vm260_vm3 = vcmp.le.s32.totalorder %v244_v24, %v772_v21  ;;  %vm261_vm4 = vcmp.le.s32.totalorder %v245_v25, %v772_v21  ;;  %vm262_vm5 = vcmp.le.s32.totalorder %v246_v26, %v772_v21  ;;  %vm229_vm14 = vcmp.lt.s32.totalorder %v772_v21, 6  ;;  %v240_v52 = vld [vmem:[%s827_s5] sm:$0xff]  ;;  %s706_s5 = smov [#allocation7]  }
  0x2d   :  { %567 = vmatprep.mubr.msk.f32.mxu0 %vm701_vm0, %v700_v0  ;;  %518 = vmatpush3.bf16.msra.mxu1 %v611_v5  ;;  %vm571_vm6 = vmpackc.low %vm260_vm3, %vm259_vm2  ;;  %vm263_vm8 = vcmp.le.s32.totalorder %v247_v27, %v772_v21  ;;  %vm264_vm9 = vcmp.le.s32.totalorder %v248_v28, %v772_v21  ;;  %vm265_vm11 = vcmp.le.s32.totalorder %v249_v30, %v772_v21  ;;  %v251_v39 = vadd.s32 64, %v243_v22  ;;  %s427_s26 = sshll.u32 %s706_s5, 4  ;;  %s428_s26 = int_to_ptr.vmem [resolvable:$true] %s427_s26 }
  0x2e   :  { %519 = vmatprep.subr.bf16.mxu1 %v700_v0  ;;  %572 = vmatpush3.bf16.msk.msra.mxu0 %vm571_vm6, %v703_v29  ;;  %vm574_vm7 = vmpackc.low %vm262_vm5, %vm261_vm4  ;;  %vm266_vm12 = vcmp.le.s32.totalorder %v250_v31, %v772_v21  ;;  %v252_v40 = vadd.s32 72, %v243_v22  ;;  %v253_v41 = vadd.s32 80, %v243_v22  ;;  %v254_v42 = vadd.s32 88, %v243_v22  ;;  %s668_s27 = scalar_lea.vmem %s428_s26, 128  ;;  %p673_p3 = scmp.lt.s32.totalorder %s428_s26, %s428_s26 }
  0x2f   :  { %573 = vmatprep.subr.bf16.mxu0 %v702_v23  ;;  %vm577_vm10 = vmpackc.low %vm264_vm9, %vm263_vm8  ;;  %vm267_vm15 = vcmp.le.s32.totalorder %v251_v39, %v772_v21  ;;  %v255_v43 = vadd.s32 96, %v243_v22  ;;  %v256_v44 = vadd.s32 104, %v243_v22  ;;  %v257_v45 = vadd.s32 112, %v243_v22  ;;  %p669_p2 = scmp.ne.s32.totalorder %s428_s26, %s668_s27  ;;  %p674_p4 = scmp.lt.s32.totalorder %s668_s27, %s668_s27 }
  0x30   :  { %vm580_vm13 = vmpackc.low %vm266_vm12, %vm265_vm11  ;;  %vm268_vm0 = vcmp.le.s32.totalorder %v252_v40, %v772_v21  ;;  %vm269_vm2 = vcmp.le.s32.totalorder %v253_v41, %v772_v21  ;;  %vm270_vm3 = vcmp.le.s32.totalorder %v254_v42, %v772_v21  ;;  %v258_v46 = vadd.s32 120, %v243_v22 }
  0x31   :  { %520 = vmatpush3.bf16.msra.mxu1 %v612_v6  ;;  %vm583_vm1 = vmpackc.low %vm268_vm0, %vm267_vm15  ;;  %vm271_vm5 = vcmp.le.s32.totalorder %v255_v43, %v772_v21  ;;  %vm272_vm6 = vcmp.le.s32.totalorder %v256_v44, %v772_v21  ;;  %vm412_vm15 = vcmp.eq.s32.totalorder %v772_v21, 0  ;;  %vm415_vm0 = vcmp.eq.s32.totalorder %v772_v21, 1  ;;  %p675_p5 = por %p674_p4, %p673_p3 }
  0x32   :  { %521 = vmatprep.subr.bf16.mxu1 %v700_v0  ;;  %575 = vmatpush3.bf16.msk.msra.mxu0 %vm574_vm7, %v703_v29  ;;  %vm586_vm4 = vmpackc.low %vm270_vm3, %vm269_vm2  ;;  %vm273_vm7 = vcmp.le.s32.totalorder %v257_v45, %v772_v21  ;;  %vm274_vm8 = vcmp.le.s32.totalorder %v258_v46, %v772_v21  ;;  %vm419_vm2 = vcmask 64512  }
  0x33   :  { %576 = vmatprep.subr.bf16.mxu0 %v702_v23  ;;  %vm589_vm9 = vmpackc.low %vm272_vm6, %vm271_vm5  ;;  %p676_p6 = pnand %p675_p5, %p669_p2 }
  0x35   :  { %522 = vmatpush3.bf16.msra.mxu1 %v613_v7 }
  0x36   :  { %523 = vmatprep.subr.bf16.mxu1 %v700_v0  ;;  %578 = vmatpush3.bf16.msk.msra.mxu0 %vm577_vm10, %v703_v29  ;;  %vm592_vm10 = vmpackc.low %vm274_vm8, %vm273_vm7 }
  0x37   :  { %579 = vmatprep.subr.bf16.mxu0 %v702_v23 }
  0x39   :  { %524 = vmatpush3.bf16.msra.mxu1 %v614_v8 }
  0x3a   :  { %525 = vmatprep.subr.bf16.mxu1 %v700_v0  ;;  %581 = vmatpush3.bf16.msk.msra.mxu0 %vm580_vm13, %v703_v29 }
  0x3b   :  { %582 = vmatprep.subr.bf16.mxu0 %v702_v23 }
  0x3d   :  { %526 = vmatpush3.bf16.msra.mxu1 %v615_v9 }
  0x3e   :  { %527 = vmatprep.subr.bf16.mxu1 %v700_v0  ;;  %584 = vmatpush3.bf16.msk.msra.mxu0 %vm583_vm1, %v703_v29  ;;  %vm417_vm1 = vcmp.eq.s32.totalorder %v772_v21, 2 }
  0x3f   :  { %585 = vmatprep.subr.bf16.mxu0 %v702_v23 }
  0x41   :  { %528 = vmatpush3.bf16.msra.mxu1 %v616_v10 }
  0x42   :  { %529 = vmatprep.subr.bf16.mxu1 %v700_v0  ;;  %587 = vmatpush3.bf16.msk.msra.mxu0 %vm586_vm4, %v703_v29  ;;  %v594_v0 = vtrunc.f32 %v240_v52 }
  0x43   :  { %588 = vmatprep.subr.bf16.mxu0 %v702_v23 }
  0x44   :  { %v595_v1 = vcvt.f32.s32 %v594_v0 }
  0x45   :  { %530 = vmatpush3.bf16.msra.mxu1 %v617_v11 }
  0x46   :  { %590 = vmatpush3.bf16.msk.msra.mxu0 %vm589_vm9, %v703_v29 }
  0x47   :  { %591 = vmatprep.subr.bf16.mxu0 %v702_v23 }
  0x4a   :  { %593 = vmatpush3.bf16.msk.msra.mxu0 %vm592_vm10, %v703_v29 }
  0xff   :  { %v108_v13 = vpop.f32.mrb[0].mxu0 }
 0x100   :  { %v109_v14 = vadd.f32 %v437_v12, %v108_v13  ;;  %v513_v15 = vpop.f32.mrb[1].mxu0 }
 0x101   :  { %v111_v16 = vpop.f32.mrb[2].mxu0 }
 0x102   :  { %618 = vtanh.f32 %v109_v14  ;;  %v514_v17 = vpop.f32.mrb[3].mxu0 }
 0x10c   :  { %v619_v18 = vpop.eup %618 }
 0x10d   :  { %v115_v19 = vpack.c.bf16 %v619_v18, %v619_v18 }
 0x10f   :  { %532 = vmatmul.mubr.bf16.vlgmr.msra.gmra.mrb[0].mxu1 %v115_v19 }
 0x1e2   :  { %v221_v33 = vpop.f32.mrb[0].mxu1 }
 0x1e3   :  { %v222_v34 = vadd.f32 %v440_v32, %v221_v33  ;;  %v533_v35 = vpop.f32.mrb[1].mxu1 }
 0x1e4   :  { %v224_v36 = vpop.f32.mrb[2].mxu1 }
 0x1e5   :  { %v534_v37 = vpop.f32.mrb[3].mxu1  ;;  %v230_v38 = vsel %vm229_vm14, %v222_v34, -1e+30 }
 0x1e6   :  { %231 = vmax.xlane.f32.xlu0 %v230_v38 }
 0x273   :  { %v232_v47 = vpop.xlane.xlu0 %231 }
 0x274   :  { %v233_v48 = vsub.f32 %v230_v38, %v232_v47 }
 0x276   :  { %v234_v49 = vmul.f32 1.442695, %v233_v48 }
 0x278   :  { %620 = vpow2.f32 %v234_v49 }
 0x282   :  { %v621_v50 = vpop.eup %620 }
 0x283   :  { %236 = vadd.xlane.f32.xlu0 %v621_v50  ;;  %568 = vmatmul.mubr.f32.vlgmr.msra.gmra.mrb[4].mxu0 %v621_v50 }
 0x310   :  { %v237_v53 = vpop.xlane.xlu0 %236 }
 0x311   :  { %v377_v54 = vmul.f32 %v240_v52, %v237_v53  ;;  %622 = vlog2.f32 %v237_v53 }
 0x313   :  { %380 = vperm.xlu1 %607, %v377_v54  }
 0x31b   :  { %v623_v12 = vpop.eup %622 }
 0x31c   :  { %v239_v13 = vmul.f32 0.6931472, %v623_v12 }
 0x356   :  { %v373_v56 = vpop.f32.mrb[4].mxu0 }
 0x357   :  { %v569_v57 = vpop.f32.mrb[5].mxu0 }
 0x392   :  { %v381_v58 = vpop.permute.xlu1 %380 }
 0x393   :  { %vm383_vm11 = vcmp.le.f32.partialorder %v373_v56, %v381_v58 }
 0x394   :  { %v384_v59 = vsel %vm383_vm11, 1, %v704_v51 }
 0x395   :  { %v386_v60 = vshrl.u32 %v384_v59, 16  ;;  %v385_v61 = vand.u32 65535, %v384_v59 }
 0x397   :  { %v388_v62 = vcvt.s32.f32 %v386_v60  ;;  %v387_v63 = vcvt.s32.f32 %v385_v61 }
 0x399   :  { %391 = vadd.xlane.f32.xlu1 %v388_v62  ;;  %389 = vadd.xlane.f32.xlu0 %v387_v63 }
 0x3af   :  { %404 = vperm.xlu0 %608, %v595_v1  }
 0x426   :  { %v392_v2 = vpop.xlane.xlu1 %391  ;;  %v390_v3 = vpop.xlane.xlu0 %389 }
 0x427   :  { %v394_v4 = vcvt.f32.s32 %v392_v2  ;;  %v393_v6 = vcvt.f32.s32 %v390_v3 }
 0x429   :  { %v395_v5 = vshll.u32 %v394_v4, 16 }
 0x42b   :  { %v396_v7 = vadd.s32 %v395_v5, %v393_v6 }
 0x42d   :  { %vm397_vm12 = vcmp.lt.s32.totalorder %v396_v7, 5 }
 0x42e   :  { %v405_v8 = vpop.permute.xlu0 %404  ;;  %v398_v9 = vsel %vm397_vm12, %v396_v7, 5 }
 0x42f   :  { %vm399_vm13 = vcmp.eq.s32.totalorder %v772_v21, %v398_v9  ;;  %vm406_vm14 = vcmp.eq.s32.totalorder %v772_v21, %v405_v8  ;;  %v413_v15 = vcvt.s32.f32 %v398_v9 }
 0x430   :  { %v400_v10 = vsel %vm399_vm13, %v233_v48, 0.0  ;;  %v407_v11 = vsel %vm406_vm14, %v233_v48, 0.0 }
 0x431   :  { %401 = vadd.xlane.f32.xlu1 %v400_v10  ;;  %v414_v18 = vsel %vm412_vm15, %v413_v15, 0.0 }
 0x435   :  { %408 = vadd.xlane.f32.xlu1 %v407_v11 }
 0x4be   :  { %v402_v14 = vpop.xlane.xlu1 %401 }
 0x4bf   :  { %v410_v16 = vsub.f32 %v402_v14, %v239_v13 }
 0x4c1   :  { %v416_v20 = vsel %vm415_vm0, %v410_v16, %v414_v18 }
 0x4c2   :  { %v409_v17 = vpop.xlane.xlu1 %408 }
 0x4c3   :  { %v411_v19 = vsub.f32 %v409_v17, %v239_v13 }
 0x4c5   :  { %v418_v22 = vsel %vm417_vm1, %v411_v19, %v416_v20 }
 0x4c6   :  { %420 = vst.msk [vmem:[#allocation7] sm:$0xff] %vm419_vm2, %v418_v22 }
 0x4c7   :  { %679 = shalt.err (!%p676_p6)
}
 0x4c8   :  { %s680_s30 = scalar_lea.hbm %s828_s6, 128 }
 0x4c9   :  { %p681_p7 = scmp.ne.s32.totalorder %s828_s6, %s680_s30  ;;  %p684_p8 = scmp.lt.u32.totalorder %s680_s30, %s828_s6 }
 0x4cb   :  { %p686_p9 = pnand %p684_p8, %p681_p7 }
 0x4cd   :  { %689 = shalt.err (!%p686_p9)
}
 0x4ce   :  { %430 = dma.vmem_to_hbm [thread:$0]  %s428_s26, 128, %s828_s6, [#allocation4]  }
 0x4cf   :  { %694 = dma.done.wait [#allocation4], 128  }
 0x4d0   :  { %695 = vsyncadd [#allocation4], 4294967168 }
 0x4d1   :  { %434 = vsyncpa [#allocation3], 1 }
 0x4d2   :  { %435 = vsyncpa [#allocation6], 1 }
 0x4d3   :  { %436 = vsyncpa [#allocation4], 1 }

</bundles_post_ra>
